<compile_context>
chip_gen: v7x
topology: tpu7x:2x2x1
jax: 0.10.0
libtpu: 0.0.40
codegen_flags: <defaults>
</compile_context>

<pallas_src>
import functools

import jax
import jax.numpy as jnp
from jax.experimental import pallas as pl
from jax.experimental.pallas import tpu as pltpu


def _round_up(n, m):
    return (n + m - 1) // m * m


def _keep_threshold(keep_prob):
    """uint32 threshold t such that P(bits < t) == keep_prob (clamped)."""
    t = int(round(float(keep_prob) * (1 << 32)))
    return max(0, min(t, (1 << 32) - 1))


def mc_dropout_kernel(x_ref, w_ref, bits_ref, b_ref, o_ref, acc_ref,
                      *, threshold, compute_dtype):
    k = pl.program_id(2)

    @pl.when(k == 0)
    def _init():
        acc_ref[...] = jnp.zeros_like(acc_ref)

    # Bernoulli(keep_prob) dropout mask fused into the weight read:
    # keep weight iff bits < keep_prob * 2^32 (one compare + one select).
    w_masked = jnp.where(
        bits_ref[...] < jnp.uint32(threshold),
        w_ref[...],
        jnp.zeros_like(w_ref),
    )

    # MXU matmul: bf16 inputs, f32 accumulation.
    acc_ref[...] += jnp.dot(
        x_ref[...].astype(compute_dtype),
        w_masked.astype(compute_dtype),
        preferred_element_type=jnp.float32,
    )

    @pl.when(k == pl.num_programs(2) - 1)
    def _finalize():
        o_ref[...] = (acc_ref[...] + b_ref[...]).astype(o_ref.dtype)


def mc_dropout_forward(x, weights, biases, dropout_prob, key,
                       *, tm=128, tn=128, tk=128,
                       compute_dtype=jnp.bfloat16):
    """Pallas forward of MC_Dropout_Layer.

    x:       (batch, input_dim)        float32
    weights: (input_dim, output_dim)   float32
    biases:  (output_dim,)             float32
    key:     jax PRNG key controlling the fresh Bernoulli mask draw
    """
    batch, input_dim = x.shape
    k_dim, output_dim = weights.shape
    assert k_dim == input_dim
    assert biases.shape == (output_dim,)

    keep_prob = 1.0 - float(dropout_prob)
    threshold = _keep_threshold(keep_prob)

    # Zero-pad every dim to a tile multiple -> lane-dense (>=128) output stores
    # and full MXU tiles. Padding is exact: padded x cols / W rows are zero, so
    # they contribute nothing; padded output cols are sliced away.
    mp = _round_up(batch, tm)
    kp = _round_up(input_dim, tk)
    np_ = _round_up(output_dim, tn)

    x_p = jnp.pad(x.astype(jnp.float32),
                  ((0, mp - batch), (0, kp - input_dim)))
    w_p = jnp.pad(weights.astype(jnp.float32),
                  ((0, kp - input_dim), (0, np_ - output_dim)))
    b_p = jnp.pad(biases.astype(jnp.float32),
                  ((0, np_ - output_dim),)).reshape(1, np_)

    # Fresh W-shaped random bits every forward call; tiled exactly like W, so
    # the per-tile mask is deterministic in the (k, j) tile index.
    bits = jax.random.bits(key, (kp, np_), dtype=jnp.uint32)

    grid = (mp // tm, np_ // tn, kp // tk)

    kernel = functools.partial(
        mc_dropout_kernel, threshold=threshold, compute_dtype=compute_dtype)

    flops = 2 * mp * np_ * kp
    bytes_accessed = 4 * (mp * kp + 2 * kp * np_ + np_ + mp * np_)

    out_p = pl.pallas_call(
        kernel,
        out_shape=jax.ShapeDtypeStruct((mp, np_), jnp.float32),
        grid=grid,
        in_specs=[
            pl.BlockSpec((tm, tk), lambda i, j, k: (i, k)),   # x tile
            pl.BlockSpec((tk, tn), lambda i, j, k: (k, j)),   # W tile
            pl.BlockSpec((tk, tn), lambda i, j, k: (k, j)),   # random bits tile
            pl.BlockSpec((1, tn), lambda i, j, k: (0, j)),    # bias tile
        ],
        out_specs=pl.BlockSpec((tm, tn), lambda i, j, k: (i, j)),
        scratch_shapes=[pltpu.VMEM((tm, tn), jnp.float32)],
        compiler_params=pltpu.CompilerParams(
            dimension_semantics=("parallel", "parallel", "arbitrary")),
        cost_estimate=pl.CostEstimate(
            flops=flops, transcendentals=0, bytes_accessed=bytes_accessed),
    )(x_p, w_p, bits, b_p)

    return out_p[:batch, :output_dim]


if __name__ == "__main__":
    # Small shapes consistent with the module's 2-D matmul forward.
    batch, input_dim, output_dim = 8, 32, 16
    dropout_prob = 0.5

    root = jax.random.PRNGKey(0)
    k_w, k_b, k_x, k_mask = jax.random.split(root, 4)

    # Deterministic init matching nn.Parameter(...).uniform_(-0.01, 0.01).
    weights = jax.random.uniform(
        k_w, (input_dim, output_dim), minval=-0.01, maxval=0.01,
        dtype=jnp.float32)
    biases = jax.random.uniform(
        k_b, (output_dim,), minval=-0.01, maxval=0.01, dtype=jnp.float32)
    x = jax.random.normal(k_x, (batch, input_dim), dtype=jnp.float32)

    out = mc_dropout_forward(x, weights, biases, dropout_prob, k_mask)
    out = jax.block_until_ready(out)

    assert out.shape == (batch, output_dim)
    assert bool(jnp.all(jnp.isfinite(out)))

    # Reference check: rebuild the exact mask the kernel applied (same key,
    # same padded bit layout, same integer threshold) and compare against a
    # bf16-input / f32-accumulate matmul.
    kp = _round_up(input_dim, 128)
    np_ = _round_up(output_dim, 128)
    bits_ref = jax.random.bits(k_mask, (kp, np_), dtype=jnp.uint32)
    bits_ref = bits_ref[:input_dim, :output_dim]
    thresh = jnp.uint32(_keep_threshold(1.0 - dropout_prob))
    mask = (bits_ref < thresh).astype(jnp.float32)

    xw = x.astype(jnp.bfloat16).astype(jnp.float32)
    ww = (weights * mask).astype(jnp.bfloat16).astype(jnp.float32)
    ref = xw @ ww + biases
    assert bool(jnp.allclose(out, ref, atol=1e-4, rtol=1e-3))

    print("KERNEL_OK")
</pallas_src>

<mosaic_0001>
module attributes {stable_mosaic.version = 11 : i64} {
  func.func @mc_dropout_kernel(%arg0: i32, %arg1: i32, %arg2: i32, %arg3: memref<128x128xf32, #tpu.memory_space<vmem>>, %arg4: memref<128x128xf32, #tpu.memory_space<vmem>>, %arg5: memref<128x128xi32, #tpu.memory_space<vmem>>, %arg6: memref<1x128xf32, #tpu.memory_space<vmem>>, %arg7: memref<128x128xf32, #tpu.memory_space<vmem>>, %arg8: memref<128x128xf32, #tpu.memory_space<vmem>>) attributes {dimension_semantics = [#tpu.dimension_semantics<parallel>, #tpu.dimension_semantics<parallel>, #tpu.dimension_semantics<arbitrary>], iteration_bounds = array<i64: 1, 1, 1>, scalar_prefetch = 0 : i64, scratch_operands = 1 : i64, tpu.core_type = #tpu.core_type<tc>, window_params = [{transform_indices = @transform_0, window_bounds = array<i64: 128, 128>}, {transform_indices = @transform_1, window_bounds = array<i64: 128, 128>}, {transform_indices = @transform_2, window_bounds = array<i64: 128, 128>}, {transform_indices = @transform_3, window_bounds = array<i64: 1, 128>}, {transform_indices = @transform_4, window_bounds = array<i64: 128, 128>}]} {
    %c0_i32 = arith.constant 0 : i32
    %0 = arith.cmpi eq, %arg2, %c0_i32 : i32
    %1 = arith.extui %0 : i1 to i32
    %c0_i32_0 = arith.constant 0 : i32
    %2 = arith.cmpi ne, %1, %c0_i32_0 : i32
    scf.if %2 {
      %cst_13 = arith.constant 0.000000e+00 : f32
      %19 = vector.broadcast %cst_13 : f32 to vector<128x128xf32>
      %c0_14 = arith.constant 0 : index
      %c0_15 = arith.constant 0 : index
      %20 = vector.load %arg8[%c0_14, %c0_15] : memref<128x128xf32, #tpu.memory_space<vmem>>, vector<128x128xf32>
      tpu.vector_store %arg8[%c0_14, %c0_15], %19 {strides = array<i32>} : memref<128x128xf32, #tpu.memory_space<vmem>>, vector<128x128xf32>,
    } else {
    }
    %c0 = arith.constant 0 : index
    %c0_1 = arith.constant 0 : index
    %3 = vector.load %arg5[%c0, %c0_1] : memref<128x128xi32, #tpu.memory_space<vmem>>, vector<128x128xi32>
    %c-2147483648_i32 = arith.constant -2147483648 : i32
    %4 = vector.broadcast %c-2147483648_i32 : i32 to vector<128x128xi32>
    %5 = arith.cmpi ult, %3, %4 : vector<128x128xi32>
    %c0_2 = arith.constant 0 : index
    %c0_3 = arith.constant 0 : index
    %6 = vector.load %arg4[%c0_2, %c0_3] : memref<128x128xf32, #tpu.memory_space<vmem>>, vector<128x128xf32>
    %cst = arith.constant 0.000000e+00 : f32
    %7 = vector.broadcast %cst : f32 to vector<128x128xf32>
    %8 = arith.select %5, %6, %7 : vector<128x128xi1>, vector<128x128xf32>
    %c0_4 = arith.constant 0 : index
    %c0_5 = arith.constant 0 : index
    %9 = vector.load %arg8[%c0_4, %c0_5] : memref<128x128xf32, #tpu.memory_space<vmem>>, vector<128x128xf32>
    %c0_6 = arith.constant 0 : index
    %c0_7 = arith.constant 0 : index
    %10 = vector.load %arg3[%c0_6, %c0_7] : memref<128x128xf32, #tpu.memory_space<vmem>>, vector<128x128xf32>
    %11 = arith.truncf %10 : vector<128x128xf32> to vector<128x128xbf16>
    %12 = arith.truncf %8 : vector<128x128xf32> to vector<128x128xbf16>
    %cst_8 = arith.constant dense<0.000000e+00> : vector<128x128xf32>
    %13 = tpu.matmul %11, %12, %cst_8 {dimension_numbers = #tpu.dot_dimension_numbers<[1], [0], [0], [1], [0, 0, 1, 1], [], []>} : vector<128x128xbf16>, vector<128x128xbf16>, vector<128x128xf32> -> vector<128x128xf32>
    %14 = arith.addf %9, %13 : vector<128x128xf32>
    %c0_9 = arith.constant 0 : index
    %c0_10 = arith.constant 0 : index
    %15 = vector.load %arg8[%c0_9, %c0_10] : memref<128x128xf32, #tpu.memory_space<vmem>>, vector<128x128xf32>
    tpu.vector_store %arg8[%c0_9, %c0_10], %14 {strides = array<i32>} : memref<128x128xf32, #tpu.memory_space<vmem>>, vector<128x128xf32>,
    %c0_i32_11 = arith.constant 0 : i32
    %16 = arith.cmpi eq, %arg2, %c0_i32_11 : i32
    %17 = arith.extui %16 : i1 to i32
    %c0_i32_12 = arith.constant 0 : i32
    %18 = arith.cmpi ne, %17, %c0_i32_12 : i32
    scf.if %18 {
      %c0_13 = arith.constant 0 : index
      %c0_14 = arith.constant 0 : index
      %19 = vector.load %arg8[%c0_13, %c0_14] : memref<128x128xf32, #tpu.memory_space<vmem>>, vector<128x128xf32>
      %c0_15 = arith.constant 0 : index
      %c0_16 = arith.constant 0 : index
      %20 = vector.load %arg6[%c0_15, %c0_16] : memref<1x128xf32, #tpu.memory_space<vmem>>, vector<1x128xf32>
      %21 = vector.broadcast %20 : vector<1x128xf32> to vector<128x128xf32>
      %22 = arith.addf %19, %21 : vector<128x128xf32>
      %c0_17 = arith.constant 0 : index
      %c0_18 = arith.constant 0 : index
      %23 = vector.load %arg7[%c0_17, %c0_18] : memref<128x128xf32, #tpu.memory_space<vmem>>, vector<128x128xf32>
      tpu.vector_store %arg7[%c0_17, %c0_18], %22 {strides = array<i32>} : memref<128x128xf32, #tpu.memory_space<vmem>>, vector<128x128xf32>,
    } else {
    }
    return
  }
  func.func @transform_0(%arg0: i32, %arg1: i32, %arg2: i32) -> (i32, i32) {
    %c0_i32 = arith.constant 0 : i32
    return %arg0, %arg2 : i32, i32
  }
  func.func @transform_1(%arg0: i32, %arg1: i32, %arg2: i32) -> (i32, i32) {
    %c0_i32 = arith.constant 0 : i32
    return %arg2, %arg1 : i32, i32
  }
  func.func @transform_2(%arg0: i32, %arg1: i32, %arg2: i32) -> (i32, i32) {
    %c0_i32 = arith.constant 0 : i32
    return %arg2, %arg1 : i32, i32
  }
  func.func @transform_3(%arg0: i32, %arg1: i32, %arg2: i32) -> (i32, i32) {
    %c0_i32 = arith.constant 0 : i32
    %c0_i32_0 = arith.constant 0 : i32
    return %c0_i32, %arg1 : i32, i32
  }
  func.func @transform_4(%arg0: i32, %arg1: i32, %arg2: i32) -> (i32, i32) {
    %c0_i32 = arith.constant 0 : i32
    return %arg0, %arg1 : i32, i32
  }
}

</mosaic_0001>

<bundles_post_ra>
// kernel: tpu_custom_call.1
= control target key start
LH: loop header
LB: loop body
LE: loop exit
PB: predicated region body
PF: predicated region fallthrough
CT: control target
= control target key end

     0   :  { %9 = vsyncpa [#allocation4], 0  ;;  %s771_s0 = inlined_call_operand.hbm [shape: f32[128,128], index: 0, kind: input, shape index: {}]   ;;  %s772_s1 = inlined_call_operand.hbm [shape: f32[128,128], index: 1, kind: input, shape index: {}]   ;;  %s773_s2 = inlined_call_operand.hbm [shape: u32[128,128], index: 2, kind: input, shape index: {}]   ;;  %s774_s3 = inlined_call_operand.vmem [shape: f32[1,128], index: 3, kind: input, shape index: {}]   ;;  %s775_s4 = inlined_call_operand.hbm [shape: f32[128,128], index: 4, kind: output, shape index: {}]  }
   0x1   :  { %10 = vsyncpa [#allocation7], 0 }
   0x2   :  { %11 = vsyncpa [#allocation5], 0  ;;  %s586_s15 = smov [#allocation6]   ;;  %s587_s17 = smov [#allocation3]  }
   0x3   :  { %s29_s16 = sshll.u32 %s586_s15, 4  ;;  %s17_s18 = sshll.u32 %s587_s17, 4  ;;  %s30_s16 = int_to_ptr.vmem [resolvable:$true] %s29_s16  ;;  %s617_s18 = int_to_ptr.vmem [resolvable:$true] %s17_s18 }
   0x4   :  { %s492_s21 = scalar_lea.hbm %s772_s1, 2048 }
   0x5   :  { %p493_p0 = scmp.ne.s32.totalorder %s772_s1, %s492_s21  ;;  %p496_p1 = scmp.lt.u32.totalorder %s492_s21, %s772_s1 }
   0x7   :  { %p498_p2 = pnand %p496_p1, %p493_p0 }
   0x9   :  { %501 = shalt.err (!%p498_p2)
}
   0xa   :  { %s502_s26 = scalar_lea.vmem %s30_s16, 2048  ;;  %p507_p4 = scmp.lt.s32.totalorder %s30_s16, %s30_s16 }
   0xb   :  { %p503_p3 = scmp.ne.s32.totalorder %s30_s16, %s502_s26  ;;  %p508_p5 = scmp.lt.s32.totalorder %s502_s26, %s502_s26 }
   0xd   :  { %p509_p6 = por %p508_p5, %p507_p4 }
   0xf   :  { %p510_p7 = pnand %p509_p6, %p503_p3 }
  0x11   :  { %513 = shalt.err (!%p510_p7)
}
  0x12   :  { %s588_s27 = smov 128   ;;  %s589_s28 = smov 8  }
  0x13   :  { %35 = dma.hbm_to_vmem [thread:$0]  %s772_s1, 2048, %s30_s16, [#allocation7], %s588_s27, %s588_s27, %s589_s28  }
  0x14   :  { %s514_s7 = scalar_lea.hbm %s771_s0, 2048 }
  0x15   :  { %p515_p8 = scmp.ne.s32.totalorder %s771_s0, %s514_s7  ;;  %p518_p9 = scmp.lt.u32.totalorder %s514_s7, %s771_s0 }
  0x17   :  { %p520_p10 = pnand %p518_p9, %p515_p8 }
  0x19   :  { %523 = shalt.err (!%p520_p10)
}
  0x1a   :  { %s524_s12 = scalar_lea.vmem %s617_s18, 2048  ;;  %p529_p12 = scmp.lt.s32.totalorder %s617_s18, %s617_s18 }
  0x1b   :  { %p525_p11 = scmp.ne.s32.totalorder %s617_s18, %s524_s12  ;;  %p530_p13 = scmp.lt.s32.totalorder %s524_s12, %s524_s12 }
  0x1d   :  { %p531_p0 = por %p530_p13, %p529_p12 }
  0x1f   :  { %p532_p1 = pnand %p531_p0, %p525_p11 }
  0x21   :  { %535 = shalt.err (!%p532_p1)
}
  0x22   :  { %23 = dma.hbm_to_vmem [thread:$0]  %s771_s0, 2048, %s617_s18, [#allocation4], %s588_s27, %s588_s27, %s589_s28  }
  0x23   :  { %s590_s14 = smov [#allocation8]   ;;  %s536_s19 = scalar_lea.hbm %s773_s2, 2048 }
  0x24   :  { %s41_s15 = sshll.u32 %s590_s14, 4  ;;  %p537_p2 = scmp.ne.s32.totalorder %s773_s2, %s536_s19  ;;  %s42_s15 = int_to_ptr.vmem [resolvable:$true] %s41_s15 }
  0x25   :  { %p540_p3 = scmp.lt.u32.totalorder %s536_s19, %s773_s2 }
  0x27   :  { %p542_p4 = pnand %p540_p3, %p537_p2 }
  0x29   :  { %545 = shalt.err (!%p542_p4)
}
  0x2a   :  { %s546_s24 = scalar_lea.vmem %s42_s15, 2048  ;;  %p551_p6 = scmp.lt.s32.totalorder %s42_s15, %s42_s15 }
  0x2b   :  { %p547_p5 = scmp.ne.s32.totalorder %s42_s15, %s546_s24  ;;  %p552_p7 = scmp.lt.s32.totalorder %s546_s24, %s546_s24 }
  0x2d   :  { %p553_p8 = por %p552_p7, %p551_p6 }
  0x2f   :  { %p554_p9 = pnand %p553_p8, %p547_p5 }
  0x31   :  { %557 = shalt.err (!%p554_p9)
}
  0x32   :  { %47 = dma.hbm_to_vmem [thread:$0]  %s773_s2, 2048, %s42_s15, [#allocation7], %s588_s27, %s588_s27, %s589_s28  }
  0x33   :  { %580 = dma.done.wait [#allocation4], 2048  }
  0x34   :  { %581 = vsyncadd [#allocation4], 4294965248 }
  0x35   :  { %582 = dma.done.wait [#allocation7], 4096  }
  0x36   :  { %583 = vsyncadd [#allocation7], 4294963200  ;;  %v80_v0 = vld [vmem:[#allocation8] sm:$0xff]  ;;  %v81_v1 = vld [vmem:[#allocation8 + $0x8] sm:$0xff] }
  0x37   :  { %v112_v2 = vld [vmem:[#allocation6] sm:$0xff]  ;;  %vm96_vm0 = vcmp.lt.u32.totalorder %v80_v0, 2147483648  ;;  %vm97_vm1 = vcmp.lt.u32.totalorder %v81_v1, 2147483648  ;;  %v113_v3 = vld [vmem:[#allocation6 + $0x8] sm:$0xff]  ;;  %v82_v4 = vld [vmem:[#allocation8 + $0x10] sm:$0xff] }
  0x38   :  { %v83_v5 = vld [vmem:[#allocation8 + $0x18] sm:$0xff]  ;;  %vm669_vm2 = vmpackc.low %vm97_vm1, %vm96_vm0  ;;  %v398_v7 = vpack.c.bf16 %v113_v3, %v112_v2  ;;  %vm98_vm3 = vcmp.lt.u32.totalorder %v82_v4, 2147483648  ;;  %v114_v8 = vld [vmem:[#allocation6 + $0x10] sm:$0xff] }
  0x39   :  { %vm99_vm4 = vcmp.lt.u32.totalorder %v83_v5, 2147483648  ;;  %v115_v9 = vld [vmem:[#allocation6 + $0x18] sm:$0xff]  ;;  %v84_v12 = vld [vmem:[#allocation8 + $0x20] sm:$0xff]  ;;  %v85_v13 = vld [vmem:[#allocation8 + $0x28] sm:$0xff] }
  0x3a   :  { %vm673_vm5 = vmpackc.low %vm99_vm4, %vm98_vm3  ;;  %v401_v11 = vpack.c.bf16 %v115_v9, %v114_v8  ;;  %438 = vmatprep.subr.msk.bf16.mxu0 %vm669_vm2, %v398_v7  ;;  %470 = vmatprep.subr.msk.bf16.mxu1 %vm669_vm2, %v398_v7  ;;  %vm100_vm6 = vcmp.lt.u32.totalorder %v84_v12, 2147483648  ;;  %vm101_vm7 = vcmp.lt.u32.totalorder %v85_v13, 2147483648  ;;  %v116_v14 = vld [vmem:[#allocation6 + $0x20] sm:$0xff]  ;;  %v117_v15 = vld [vmem:[#allocation6 + $0x28] sm:$0xff] }
  0x3b   :  { %439 = vmatpush3.bf16.msk.msra.mxu0 %vm669_vm2, %v398_v7  ;;  %478 = vmatpush3.bf16.msk.msra.mxu1 %vm669_vm2, %v398_v7  ;;  %v86_v16 = vld [vmem:[#allocation8 + $0x30] sm:$0xff]  ;;  %v87_v17 = vld [vmem:[#allocation8 + $0x38] sm:$0xff]  ;;  %v404_v18 = vpack.c.bf16 %v117_v15, %v116_v14  ;;  %vm689_vm8 = vmpackc.low %vm101_vm7, %vm100_vm6 }
  0x3c   :  { %440 = vmatprep.subr.msk.bf16.mxu0 %vm673_vm5, %v401_v11  ;;  %471 = vmatprep.subr.msk.bf16.mxu1 %vm673_vm5, %v401_v11  ;;  %v118_v20 = vld [vmem:[#allocation6 + $0x30] sm:$0xff]  ;;  %v119_v21 = vld [vmem:[#allocation6 + $0x38] sm:$0xff]  ;;  %vm102_vm9 = vcmp.lt.u32.totalorder %v86_v16, 2147483648  ;;  %vm103_vm10 = vcmp.lt.u32.totalorder %v87_v17, 2147483648  ;;  %v88_v22 = vld [vmem:[#allocation8 + $0x40] sm:$0xff] }
  0x3d   :  { %v89_v23 = vld [vmem:[#allocation8 + $0x48] sm:$0xff]  ;;  %v407_v24 = vpack.c.bf16 %v119_v21, %v118_v20  ;;  %vm701_vm11 = vmpackc.low %vm103_vm10, %vm102_vm9  ;;  %v120_v26 = vld [vmem:[#allocation6 + $0x40] sm:$0xff]  ;;  %vm104_vm12 = vcmp.lt.u32.totalorder %v88_v22, 2147483648 }
  0x3e   :  { %v121_v27 = vld [vmem:[#allocation6 + $0x48] sm:$0xff]  ;;  %vm105_vm13 = vcmp.lt.u32.totalorder %v89_v23, 2147483648  ;;  %v90_v28 = vld [vmem:[#allocation8 + $0x50] sm:$0xff]  ;;  %v91_v29 = vld [vmem:[#allocation8 + $0x58] sm:$0xff] }
  0x3f   :  { %441 = vmatpush3.bf16.msk.msra.mxu0 %vm673_vm5, %v401_v11  ;;  %479 = vmatpush3.bf16.msk.msra.mxu1 %vm673_vm5, %v401_v11  ;;  %v160_v30 = vld [vmem:[#allocation3] sm:$0xff]  ;;  %v161_v31 = vld [vmem:[#allocation3 + $0x8] sm:$0xff]  ;;  %v410_v32 = vpack.c.bf16 %v121_v27, %v120_v26  ;;  %vm713_vm14 = vmpackc.low %vm105_vm13, %vm104_vm12  ;;  %vm106_vm15 = vcmp.lt.u32.totalorder %v90_v28, 2147483648  ;;  %vm107_vm0 = vcmp.lt.u32.totalorder %v91_v29, 2147483648 }
  0x40   :  { %442 = vmatprep.subr.msk.bf16.mxu0 %vm689_vm8, %v404_v18  ;;  %472 = vmatprep.subr.msk.bf16.mxu1 %vm689_vm8, %v404_v18  ;;  %v176_v33 = vpack.c.bf16 %v161_v31, %v160_v30  ;;  %v168_v34 = vld [vmem:[#allocation3 + $0x40] sm:$0xff]  ;;  %v169_v35 = vld [vmem:[#allocation3 + $0x48] sm:$0xff]  ;;  %v122_v37 = vld [vmem:[#allocation6 + $0x50] sm:$0xff] }
  0x41   :  { %v123_v38 = vld [vmem:[#allocation6 + $0x58] sm:$0xff]  ;;  %v180_v39 = vpack.c.bf16 %v169_v35, %v168_v34  ;;  %v92_v40 = vld [vmem:[#allocation8 + $0x60] sm:$0xff]  ;;  %v93_v41 = vld [vmem:[#allocation8 + $0x68] sm:$0xff] }
  0x42   :  { %454 = vmatprep.mubr.bf16.mxu0 %v176_v33  ;;  %v413_v42 = vpack.c.bf16 %v123_v38, %v122_v37  ;;  %vm725_vm1 = vmpackc.low %vm107_vm0, %vm106_vm15  ;;  %v124_v44 = vld [vmem:[#allocation6 + $0x60] sm:$0xff]  ;;  %v125_v45 = vld [vmem:[#allocation6 + $0x68] sm:$0xff]  ;;  %vm108_vm2 = vcmp.lt.u32.totalorder %v92_v40, 2147483648  ;;  %vm109_vm3 = vcmp.lt.u32.totalorder %v93_v41, 2147483648 }
  0x43   :  { %443 = vmatpush3.bf16.msk.msra.mxu0 %vm689_vm8, %v404_v18  ;;  %480 = vmatpush3.bf16.msk.msra.mxu1 %vm689_vm8, %v404_v18  ;;  %v94_v46 = vld [vmem:[#allocation8 + $0x70] sm:$0xff]  ;;  %v95_v47 = vld [vmem:[#allocation8 + $0x78] sm:$0xff]  ;;  %v416_v48 = vpack.c.bf16 %v125_v45, %v124_v44  ;;  %vm415_vm4 = vmpackc.low %vm109_vm3, %vm108_vm2 }
  0x44   :  { %444 = vmatprep.subr.msk.bf16.mxu0 %vm701_vm11, %v407_v24  ;;  %473 = vmatprep.subr.msk.bf16.mxu1 %vm701_vm11, %v407_v24  ;;  %v126_v49 = vld [vmem:[#allocation6 + $0x70] sm:$0xff]  ;;  %v127_v50 = vld [vmem:[#allocation6 + $0x78] sm:$0xff]  ;;  %vm110_vm5 = vcmp.lt.u32.totalorder %v94_v46, 2147483648  ;;  %vm111_vm6 = vcmp.lt.u32.totalorder %v95_v47, 2147483648  ;;  %v164_v57 = vld [vmem:[#allocation3 + $0x20] sm:$0xff] }
  0x45   :  { %462 = vmatprep.mubr.bf16.mxu1 %v180_v39  ;;  %v419_v51 = vpack.c.bf16 %v127_v50, %v126_v49  ;;  %vm741_vm7 = vmpackc.low %vm111_vm6, %vm110_vm5  ;;  %v162_v53 = vld [vmem:[#allocation3 + $0x10] sm:$0xff]  ;;  %v163_v54 = vld [vmem:[#allocation3 + $0x18] sm:$0xff] }
  0x46   :  { %v170_v55 = vld [vmem:[#allocation3 + $0x50] sm:$0xff]  ;;  %v171_v56 = vld [vmem:[#allocation3 + $0x58] sm:$0xff]  ;;  %v165_v58 = vld [vmem:[#allocation3 + $0x28] sm:$0xff]  ;;  %v177_v61 = vpack.c.bf16 %v163_v54, %v162_v53 }
  0x47   :  { %445 = vmatpush3.bf16.msk.msra.mxu0 %vm701_vm11, %v407_v24  ;;  %481 = vmatpush3.bf16.msk.msra.mxu1 %vm701_vm11, %v407_v24  ;;  %v172_v59 = vld [vmem:[#allocation3 + $0x60] sm:$0xff]  ;;  %v173_v60 = vld [vmem:[#allocation3 + $0x68] sm:$0xff]  ;;  %v181_v62 = vpack.c.bf16 %v171_v56, %v170_v55  ;;  %v178_v63 = vpack.c.bf16 %v165_v58, %v164_v57  ;;  %v166_v1 = vld [vmem:[#allocation3 + $0x30] sm:$0xff] }
  0x48   :  { %446 = vmatprep.subr.msk.bf16.mxu0 %vm713_vm14, %v410_v32  ;;  %474 = vmatprep.subr.msk.bf16.mxu1 %vm713_vm14, %v410_v32  ;;  %v182_v0 = vpack.c.bf16 %v173_v60, %v172_v59  ;;  %v167_v2 = vld [vmem:[#allocation3 + $0x38] sm:$0xff]  ;;  %v174_v3 = vld [vmem:[#allocation3 + $0x70] sm:$0xff]  ;;  %v421_v7 = vld [vmem:[%s774_s3] ss:$0 sm:$0xff]  ;;  %s591_s3 = smov [#allocation9]  }
  0x49   :  { %v175_v4 = vld [vmem:[#allocation3 + $0x78] sm:$0xff]  ;;  %v179_v5 = vpack.c.bf16 %v167_v2, %v166_v1  ;;  %s384_s26 = sshll.u32 %s591_s3, 4  ;;  %s385_s26 = int_to_ptr.vmem [resolvable:$true] %s384_s26 }
  0x4a   :  { %v183_v6 = vpack.c.bf16 %v175_v4, %v174_v3  ;;  %s558_s29 = scalar_lea.vmem %s385_s26, 2048  ;;  %p563_p11 = scmp.lt.s32.totalorder %s385_s26, %s385_s26 }
  0x4b   :  { %447 = vmatpush3.bf16.msk.msra.mxu0 %vm713_vm14, %v410_v32  ;;  %482 = vmatpush3.bf16.msk.msra.mxu1 %vm713_vm14, %v410_v32  ;;  %p559_p10 = scmp.ne.s32.totalorder %s385_s26, %s558_s29  ;;  %p564_p12 = scmp.lt.s32.totalorder %s558_s29, %s558_s29 }
  0x4c   :  { %448 = vmatprep.subr.msk.bf16.mxu0 %vm725_vm1, %v413_v42  ;;  %475 = vmatprep.subr.msk.bf16.mxu1 %vm725_vm1, %v413_v42 }
  0x4d   :  { %p565_p13 = por %p564_p12, %p563_p11 }
  0x4f   :  { %449 = vmatpush3.bf16.msk.msra.mxu0 %vm725_vm1, %v413_v42  ;;  %483 = vmatpush3.bf16.msk.msra.mxu1 %vm725_vm1, %v413_v42  ;;  %p566_p0 = pnand %p565_p13, %p559_p10 }
  0x50   :  { %450 = vmatprep.subr.msk.bf16.mxu0 %vm415_vm4, %v416_v48  ;;  %476 = vmatprep.subr.msk.bf16.mxu1 %vm415_vm4, %v416_v48 }
  0x53   :  { %451 = vmatpush3.bf16.msk.msra.mxu0 %vm415_vm4, %v416_v48  ;;  %484 = vmatpush3.bf16.msk.msra.mxu1 %vm415_vm4, %v416_v48 }
  0x54   :  { %452 = vmatprep.subr.msk.bf16.mxu0 %vm741_vm7, %v419_v51  ;;  %477 = vmatprep.subr.msk.bf16.mxu1 %vm741_vm7, %v419_v51 }
  0x57   :  { %453 = vmatpush3.bf16.msk.msra.mxu0 %vm741_vm7, %v419_v51  ;;  %485 = vmatpush3.bf16.msk.msra.mxu1 %vm741_vm7, %v419_v51 }
  0x5a   :  { %455 = vmatmul.mubr.bf16.vlgmr.msra.gmra.mrb[0].mxu0 %v177_v61  ;;  %463 = vmatmul.mubr.bf16.vlgmr.msra.gmra.mrb[0].mxu1 %v181_v62 }
  0x5b   :  { %458 = vmatprep.mubr.bf16.mxu0 %v178_v63  ;;  %466 = vmatprep.mubr.bf16.mxu1 %v182_v0 }
  0x62   :  { %459 = vmatmul.mubr.bf16.gmra.mrb[4].mxu0 %v179_v5  ;;  %467 = vmatmul.mubr.bf16.gmra.mrb[4].mxu1 %v183_v6 }
 0x12d   :  { %v456_v8 = vpop.f32.mrb[0].mxu0  ;;  %v464_v9 = vpop.f32.mrb[0].mxu1 }
 0x12e   :  { %v349_v10 = vadd.f32 %v456_v8, %v421_v7  ;;  %v357_v11 = vadd.f32 %v464_v9, %v421_v7  ;;  %v226_v12 = vpop.f32.mrb[1].mxu0  ;;  %v258_v13 = vpop.f32.mrb[1].mxu1 }
 0x12f   :  { %v347_v14 = vadd.f32 %v421_v7, %v226_v12  ;;  %v355_v15 = vadd.f32 %v421_v7, %v258_v13  ;;  %v457_v16 = vpop.f32.mrb[2].mxu0  ;;  %v465_v17 = vpop.f32.mrb[2].mxu1 }
 0x130   :  { %365 = vst [vmem:[#allocation9 + $0x10] sm:$0xff] %v349_v10  ;;  %373 = vst [vmem:[#allocation9 + $0x50] sm:$0xff] %v357_v11  ;;  %v350_v18 = vadd.f32 %v457_v16, %v421_v7  ;;  %v358_v19 = vadd.f32 %v465_v17, %v421_v7  ;;  %v229_v20 = vpop.f32.mrb[3].mxu0  ;;  %v261_v21 = vpop.f32.mrb[3].mxu1 }
 0x131   :  { %363 = vst [vmem:[#allocation9] sm:$0xff] %v347_v14  ;;  %371 = vst [vmem:[#allocation9 + $0x40] sm:$0xff] %v355_v15  ;;  %v348_v22 = vadd.f32 %v421_v7, %v229_v20  ;;  %v356_v23 = vadd.f32 %v421_v7, %v261_v21 }
 0x132   :  { %366 = vst [vmem:[#allocation9 + $0x18] sm:$0xff] %v350_v18  ;;  %374 = vst [vmem:[#allocation9 + $0x58] sm:$0xff] %v358_v19 }
 0x133   :  { %364 = vst [vmem:[#allocation9 + $0x8] sm:$0xff] %v348_v22  ;;  %372 = vst [vmem:[#allocation9 + $0x48] sm:$0xff] %v356_v23 }
 0x135   :  { %v460_v24 = vpop.f32.mrb[4].mxu0  ;;  %v468_v25 = vpop.f32.mrb[4].mxu1 }
 0x136   :  { %v353_v26 = vadd.f32 %v460_v24, %v421_v7  ;;  %v361_v27 = vadd.f32 %v468_v25, %v421_v7  ;;  %v242_v28 = vpop.f32.mrb[5].mxu0  ;;  %v274_v29 = vpop.f32.mrb[5].mxu1 }
 0x137   :  { %v351_v30 = vadd.f32 %v421_v7, %v242_v28  ;;  %v359_v31 = vadd.f32 %v421_v7, %v274_v29  ;;  %v461_v32 = vpop.f32.mrb[6].mxu0  ;;  %v469_v33 = vpop.f32.mrb[6].mxu1 }
 0x138   :  { %369 = vst [vmem:[#allocation9 + $0x30] sm:$0xff] %v353_v26  ;;  %377 = vst [vmem:[#allocation9 + $0x70] sm:$0xff] %v361_v27  ;;  %v354_v34 = vadd.f32 %v461_v32, %v421_v7  ;;  %v362_v35 = vadd.f32 %v469_v33, %v421_v7  ;;  %v245_v36 = vpop.f32.mrb[7].mxu0  ;;  %v277_v37 = vpop.f32.mrb[7].mxu1 }
 0x139   :  { %367 = vst [vmem:[#allocation9 + $0x20] sm:$0xff] %v351_v30  ;;  %375 = vst [vmem:[#allocation9 + $0x60] sm:$0xff] %v359_v31  ;;  %v352_v38 = vadd.f32 %v421_v7, %v245_v36  ;;  %v360_v39 = vadd.f32 %v421_v7, %v277_v37 }
 0x13a   :  { %370 = vst [vmem:[#allocation9 + $0x38] sm:$0xff] %v354_v34  ;;  %378 = vst [vmem:[#allocation9 + $0x78] sm:$0xff] %v362_v35 }
 0x13b   :  { %368 = vst [vmem:[#allocation9 + $0x28] sm:$0xff] %v352_v38  ;;  %376 = vst [vmem:[#allocation9 + $0x68] sm:$0xff] %v360_v39 }
 0x13c   :  { %569 = shalt.err (!%p566_p0)
}
 0x13d   :  { %s570_s6 = scalar_lea.hbm %s775_s4, 2048 }
 0x13e   :  { %p571_p1 = scmp.ne.s32.totalorder %s775_s4, %s570_s6  ;;  %p574_p2 = scmp.lt.u32.totalorder %s570_s6, %s775_s4 }
 0x140   :  { %p576_p3 = pnand %p574_p2, %p571_p1 }
 0x142   :  { %579 = shalt.err (!%p576_p3)
}
 0x143   :  { %390 = dma.vmem_to_hbm [thread:$0]  %s385_s26, 2048, %s775_s4, [#allocation5], %s588_s27, %s588_s27, %s589_s28  }
 0x144   :  { %584 = dma.done.wait [#allocation5], 2048  }
 0x145   :  { %585 = vsyncadd [#allocation5], 4294965248 }
 0x146   :  { %394 = vsyncpa [#allocation4], 1 }
 0x147   :  { %395 = vsyncpa [#allocation7], 1 }
 0x148   :  { %396 = vsyncpa [#allocation5], 1 }

</bundles_post_ra>
